<compile_context>
chip_gen: v7x
topology: tpu7x:2x2x1
jax: 0.10.0
libtpu: 0.0.40
codegen_flags: <defaults>
</compile_context>

<pallas_src>
import jax
import jax.numpy as jnp
from jax.experimental import pallas as pl
from jax.experimental.pallas import tpu as pltpu


def _round_up(x, m):
    return ((x + m - 1) // m) * m


def _time_embedding_kernel(t_ref, p_ref, o_ref):
    # t_ref: (bm, k) packed time values. k == 1 -> plain broadcast path;
    #        k > 1  -> each row holds consecutive time samples (zero padded to
    #        k lanes) that expand to dim-wide lane groups of the output row.
    # p_ref: (4, width)      when k == 1
    #        (8 + k, width)  when k > 1: rows 0..3 = [w_t; b_t; w_p; b_p] tiled
    #        across lane groups, rows 4..7 zero pad (keeps E 8-sublane aligned),
    #        rows 8..8+k-1 = expansion matrix E with E[j, lane] = (lane//dim == j).
    # o_ref: (bm, width) lane-dense output block.
    k = t_ref.shape[-1]

    wt = p_ref[0:1, :]
    bt = p_ref[1:2, :]
    wp = p_ref[2:3, :]
    bp = p_ref[3:4, :]

    if k == 1:
        t_exp = t_ref[...]                     # (bm, 1): rank-1 VPU broadcast
    else:
        # MXU expansion: t_exp[i, lane] = t[i, lane // dim]. One small matmul
        # in the otherwise-idle MXU replaces the old XLU/VALU where-chain.
        e = p_ref[8:8 + k, :]                  # (k, width) 0/1 matrix
        t_exp = jnp.dot(t_ref[...], e, preferred_element_type=jnp.float32)

    trend = jnp.maximum(t_exp * wt + bt, 0.0)  # relu(linear_trend(t))
    # NOTE: jnp.sin is not an EUP op (VALU polynomial); if a bundle dump shows
    # VALU-bound on v6e/v7x, a bounded-range polynomial could replace it.
    period = jnp.sin(t_exp * wp + bp)          # sin(linear_period(t))
    o_ref[...] = (trend + period).astype(o_ref.dtype)


def time_embedding(t, w_trend, b_trend, w_period, b_period, *,
                   block_rows=4096, out_dtype=jnp.float32):
    """t: (..., 1) float32. Returns (..., dim) of `out_dtype` (default f32).

    w_trend/w_period: (dim, 1) as in nn.Linear(1, dim); b_trend/b_period: (dim,).
    Pass out_dtype=jnp.bfloat16 to halve HBM writeback if the consumer allows it.
    """
    dim = int(w_trend.shape[0])
    orig_shape = t.shape
    assert orig_shape[-1] == 1, "TimeEmbedding expects last dim == 1"
    t2 = jnp.asarray(t, jnp.float32).reshape(-1)          # (N,)
    n = t2.shape[0]

    params = jnp.stack(
        [jnp.asarray(w_trend, jnp.float32).reshape(dim),
         jnp.asarray(b_trend, jnp.float32).reshape(dim),
         jnp.asarray(w_period, jnp.float32).reshape(dim),
         jnp.asarray(b_period, jnp.float32).reshape(dim)], axis=0)   # (4, dim)

    # Lane-dense repack: fold r = 128 // dim consecutive rows into one 128-lane
    # output row (unmasked stores, fully packed writeback). Zero-pad n up to a
    # multiple of r if needed and slice the output back.
    r = 128 // dim if (dim < 128 and 128 % dim == 0) else 1
    rows = pl.cdiv(n, r)
    n_pad = rows * r
    width = r * dim

    if r == 1:
        t_view = t2.reshape(rows, 1)
        p_in = params                                                  # (4, width)
    else:
        kdim = max(r, 8)   # contraction dim >= 8 for friendly MXU shapes
        t_flat = t2 if n_pad == n else jnp.pad(t2, (0, n_pad - n))
        t_view = t_flat.reshape(rows, r)
        if kdim > r:
            t_view = jnp.pad(t_view, ((0, 0), (0, kdim - r)))          # (rows, kdim)
        params_t = jnp.tile(params, (1, r))                            # (4, width)
        lane = jnp.arange(width, dtype=jnp.int32) // dim
        e = (lane[None, :] == jnp.arange(kdim, dtype=jnp.int32)[:, None])
        e = e.astype(jnp.float32)                                      # (kdim, width)
        p_in = jnp.concatenate(
            [params_t, jnp.zeros((4, width), jnp.float32), e], axis=0)  # (8+kdim, width)

    # Row tile: large (low per-step overhead), balanced, and never a single
    # block when rows is big (>=2 grid steps -> v7x megacore + DMA overlap).
    bm_max = max(8, (min(block_rows, 8192) // 8) * 8)
    if rows <= 8:
        bm = rows                                  # tiny full-extent block
    else:
        n_steps = max(2, pl.cdiv(rows, bm_max))
        bm = min(bm_max, _round_up(pl.cdiv(rows, n_steps), 8))
    grid = (pl.cdiv(rows, bm),)

    # Scoped-VMEM budget: the (bm, k) t block pads to 128 lanes per row, so it
    # costs as much VMEM/row as an f32 output block; account for both (x2 for
    # double buffering) and pass the limit explicitly (v5e default is 16 MiB).
    itemsize = jnp.dtype(out_dtype).itemsize
    lane_w = _round_up(max(width, 128), 128)
    vmem_needed = 2 * (bm * lane_w * itemsize                 # output block
                       + bm * 128 * 4                         # packed-t block
                       + _round_up(p_in.shape[0], 8) * lane_w * 4)
    vmem_limit = int(min(max(vmem_needed + (2 << 20), 16 << 20), 32 << 20))

    kdim_in = t_view.shape[1]
    out = pl.pallas_call(
        _time_embedding_kernel,
        out_shape=jax.ShapeDtypeStruct((rows, width), out_dtype),
        grid_spec=pltpu.PrefetchScalarGridSpec(
            num_scalar_prefetch=0,
            grid=grid,
            in_specs=[
                pl.BlockSpec((bm, kdim_in), lambda i: (i, 0)),   # packed t rows
                pl.BlockSpec(p_in.shape, lambda i: (0, 0)),      # fused params + E
            ],
            out_specs=pl.BlockSpec((bm, width), lambda i: (i, 0)),
        ),
        compiler_params=pltpu.CompilerParams(
            dimension_semantics=("parallel",),
            vmem_limit_bytes=vmem_limit),
    )(t_view, p_in)

    # Free reshape: (rows, r*dim) and (n_pad, dim) are the same row-major bytes.
    out = out.reshape(n_pad, dim)
    if n_pad != n:
        out = out[:n]
    return out.reshape(*orig_shape[:-1], dim)


if __name__ == "__main__":
    dim = 32
    batch, seq = 2, 8

    key = jax.random.PRNGKey(0)
    (k_t, k_wt, k_bt, k_wp, k_bp, k_t2, k_t3,
     k_wt2, k_bt2, k_wp2, k_bp2, k_t4) = jax.random.split(key, 12)

    # Deterministic synthetic parameters matching nn.Linear(1, dim) shapes.
    w_trend = jax.random.normal(k_wt, (dim, 1), jnp.float32) * 0.5
    b_trend = jax.random.normal(k_bt, (dim,), jnp.float32) * 0.1
    w_period = jax.random.normal(k_wp, (dim, 1), jnp.float32) * 0.5
    b_period = jax.random.normal(k_bp, (dim,), jnp.float32) * 0.1

    def ref_fn(t, wt, bt, wp, bp):
        trend = jax.nn.relu(t * wt.reshape(-1) + bt)
        period = jnp.sin(t * wp.reshape(-1) + bp)
        return trend + period

    # Primary small case: (batch, seq, 1) time values (MXU-expansion path).
    t = jax.random.normal(k_t, (batch, seq, 1), jnp.float32)
    out = jax.block_until_ready(
        time_embedding(t, w_trend, b_trend, w_period, b_period))
    assert out.shape == (batch, seq, dim), out.shape
    assert jnp.allclose(out, ref_fn(t, w_trend, b_trend, w_period, b_period),
                        atol=1e-5, rtol=1e-5), "mismatch (small case)"

    # Multi-block grid with a ragged last tile.
    t_big = jax.random.normal(k_t2, (3, 100, 1), jnp.float32)
    out_big = jax.block_until_ready(
        time_embedding(t_big, w_trend, b_trend, w_period, b_period, block_rows=8))
    assert jnp.allclose(out_big,
                        ref_fn(t_big, w_trend, b_trend, w_period, b_period),
                        atol=1e-5, rtol=1e-5), "mismatch (tiled case)"

    # n not a multiple of the fold factor -> zero-pad + output-slice path.
    t_odd = jax.random.normal(k_t3, (1, 7, 1), jnp.float32)
    out_odd = jax.block_until_ready(
        time_embedding(t_odd, w_trend, b_trend, w_period, b_period))
    assert jnp.allclose(out_odd,
                        ref_fn(t_odd, w_trend, b_trend, w_period, b_period),
                        atol=1e-5, rtol=1e-5), "mismatch (padded case)"

    # bf16 output (halves HBM writeback; biggest single win on v5e).
    out_bf16 = jax.block_until_ready(
        time_embedding(t_big, w_trend, b_trend, w_period, b_period,
                       out_dtype=jnp.bfloat16))
    assert jnp.allclose(out_bf16.astype(jnp.float32),
                        ref_fn(t_big, w_trend, b_trend, w_period, b_period),
                        atol=5e-2, rtol=5e-2), "mismatch (bf16 case)"

    # dim that does not divide 128 -> r == 1 broadcast fallback path.
    dim2 = 48
    w_t2 = jax.random.normal(k_wt2, (dim2, 1), jnp.float32) * 0.5
    b_t2 = jax.random.normal(k_bt2, (dim2,), jnp.float32) * 0.1
    w_p2 = jax.random.normal(k_wp2, (dim2, 1), jnp.float32) * 0.5
    b_p2 = jax.random.normal(k_bp2, (dim2,), jnp.float32) * 0.1
    t_f = jax.random.normal(k_t4, (2, 8, 1), jnp.float32)
    out_f = jax.block_until_ready(time_embedding(t_f, w_t2, b_t2, w_p2, b_p2))
    assert jnp.allclose(out_f, ref_fn(t_f, w_t2, b_t2, w_p2, b_p2),
                        atol=1e-5, rtol=1e-5), "mismatch (fallback case)"

    print("KERNEL_OK")
</pallas_src>

<mosaic_0001>
module attributes {stable_mosaic.version = 11 : i64} {
  func.func @_time_embedding_kernel(%arg0: i32, %arg1: memref<4x8xf32, #tpu.memory_space<vmem>>, %arg2: memref<16x128xf32, #tpu.memory_space<vmem>>, %arg3: memref<4x128xf32, #tpu.memory_space<vmem>>) attributes {dimension_semantics = [#tpu.dimension_semantics<parallel>], iteration_bounds = array<i64: 1>, scalar_prefetch = 0 : i64, scratch_operands = 0 : i64, tpu.core_type = #tpu.core_type<tc>, window_params = [{transform_indices = @transform_0, window_bounds = array<i64: 4, 8>}, {pipeline_mode = #tpu.pipeline_mode<synchronous>, transform_indices = @transform_1, window_bounds = array<i64: 16, 128>}, {transform_indices = @transform_2, window_bounds = array<i64: 4, 128>}]} {
    %c0 = arith.constant 0 : index
    %c0_0 = arith.constant 0 : index
    %0 = vector.load %arg2[%c0, %c0_0] : memref<16x128xf32, #tpu.memory_space<vmem>>, vector<1x128xf32>
    %c1 = arith.constant 1 : index
    %c0_1 = arith.constant 0 : index
    %1 = vector.load %arg2[%c1, %c0_1] : memref<16x128xf32, #tpu.memory_space<vmem>>, vector<1x128xf32>
    %c2 = arith.constant 2 : index
    %c0_2 = arith.constant 0 : index
    %2 = vector.load %arg2[%c2, %c0_2] : memref<16x128xf32, #tpu.memory_space<vmem>>, vector<1x128xf32>
    %c3 = arith.constant 3 : index
    %c0_3 = arith.constant 0 : index
    %3 = vector.load %arg2[%c3, %c0_3] : memref<16x128xf32, #tpu.memory_space<vmem>>, vector<1x128xf32>
    %c8 = arith.constant 8 : index
    %c0_4 = arith.constant 0 : index
    %4 = vector.load %arg2[%c8, %c0_4] : memref<16x128xf32, #tpu.memory_space<vmem>>, vector<8x128xf32>
    %c0_5 = arith.constant 0 : index
    %c0_6 = arith.constant 0 : index
    %5 = vector.load %arg1[%c0_5, %c0_6] : memref<4x8xf32, #tpu.memory_space<vmem>>, vector<4x8xf32>
    %cst = arith.constant dense<0.000000e+00> : vector<4x128xf32>
    %6 = tpu.matmul %5, %4, %cst {dimension_numbers = #tpu.dot_dimension_numbers<[1], [0], [0], [1], [0, 0, 1, 1], [], []>} : vector<4x8xf32>, vector<8x128xf32>, vector<4x128xf32> -> vector<4x128xf32>
    %7 = vector.broadcast %0 : vector<1x128xf32> to vector<4x128xf32>
    %8 = arith.mulf %6, %7 : vector<4x128xf32>
    %9 = vector.broadcast %1 : vector<1x128xf32> to vector<4x128xf32>
    %10 = arith.addf %8, %9 : vector<4x128xf32>
    %cst_7 = arith.constant 0.000000e+00 : f32
    %11 = vector.broadcast %cst_7 : f32 to vector<4x128xf32>
    %12 = arith.maximumf %10, %11 : vector<4x128xf32>
    %13 = vector.broadcast %2 : vector<1x128xf32> to vector<4x128xf32>
    %14 = arith.mulf %6, %13 : vector<4x128xf32>
    %15 = vector.broadcast %3 : vector<1x128xf32> to vector<4x128xf32>
    %16 = arith.addf %14, %15 : vector<4x128xf32>
    %17 = math.sin %16 : vector<4x128xf32>
    %18 = arith.addf %12, %17 : vector<4x128xf32>
    %c0_8 = arith.constant 0 : index
    %c0_9 = arith.constant 0 : index
    %19 = vector.load %arg3[%c0_8, %c0_9] : memref<4x128xf32, #tpu.memory_space<vmem>>, vector<4x128xf32>
    tpu.vector_store %arg3[%c0_8, %c0_9], %18 {strides = array<i32>} : memref<4x128xf32, #tpu.memory_space<vmem>>, vector<4x128xf32>,
    return
  }
  func.func @transform_0(%arg0: i32) -> (i32, i32) {
    %c0_i32 = arith.constant 0 : i32
    %c0_i32_0 = arith.constant 0 : i32
    return %arg0, %c0_i32 : i32, i32
  }
  func.func @transform_1(%arg0: i32) -> (i32, i32) {
    %c0_i32 = arith.constant 0 : i32
    %c0_i32_0 = arith.constant 0 : i32
    %c0_i32_1 = arith.constant 0 : i32
    return %c0_i32, %c0_i32_0 : i32, i32
  }
  func.func @transform_2(%arg0: i32) -> (i32, i32) {
    %c0_i32 = arith.constant 0 : i32
    %c0_i32_0 = arith.constant 0 : i32
    return %arg0, %c0_i32 : i32, i32
  }
}

</mosaic_0001>

<bundles_post_ra>
// kernel: tpu_custom_call.1
= control target key start
LH: loop header
LB: loop body
LE: loop exit
PB: predicated region body
PF: predicated region fallthrough
CT: control target
= control target key end

     0   :  { %7 = vsyncpa [#allocation3], 0  ;;  %s466_s0 = inlined_call_operand.hbm [shape: f32[4,8], index: 0, kind: input, shape index: {}]   ;;  %s467_s1 = inlined_call_operand.hbm [shape: f32[16,128], index: 1, kind: input, shape index: {}]   ;;  %s468_s2 = inlined_call_operand.hbm [shape: f32[4,128], index: 2, kind: output, shape index: {}]  }
   0x1   :  { %8 = vsyncpa [#allocation6], 0 }
   0x2   :  { %9 = vsyncpa [#allocation4], 0  ;;  %s370_s9 = smov [#allocation2]   ;;  %s371_s11 = smov [#allocation5]  }
   0x3   :  { %s16_s10 = sshll.u32 %s370_s9, 4  ;;  %s25_s12 = sshll.u32 %s371_s11, 4  ;;  %s17_s10 = int_to_ptr.vmem [resolvable:$true] %s16_s10  ;;  %s398_s12 = int_to_ptr.vmem [resolvable:$true] %s25_s12 }
   0x4   :  { %s298_s15 = scalar_lea.hbm %s466_s0, 64 }
   0x5   :  { %p299_p0 = scmp.ne.s32.totalorder %s466_s0, %s298_s15  ;;  %p302_p1 = scmp.lt.u32.totalorder %s298_s15, %s466_s0 }
   0x7   :  { %p304_p2 = pnand %p302_p1, %p299_p0 }
   0x9   :  { %307 = shalt.err (!%p304_p2)
}
   0xa   :  { %s308_s20 = scalar_lea.vmem %s17_s10, 64  ;;  %p313_p4 = scmp.lt.s32.totalorder %s17_s10, %s17_s10 }
   0xb   :  { %p309_p3 = scmp.ne.s32.totalorder %s17_s10, %s308_s20  ;;  %p314_p5 = scmp.lt.s32.totalorder %s308_s20, %s308_s20 }
   0xd   :  { %p315_p6 = por %p314_p5, %p313_p4 }
   0xf   :  { %p316_p7 = pnand %p315_p6, %p309_p3 }
  0x11   :  { %319 = shalt.err (!%p316_p7)
}
  0x12   :  { %19 = dma.hbm_to_vmem [thread:$0]  %s466_s0, 64, %s17_s10, [#allocation3]  }
  0x13   :  { %s320_s25 = scalar_lea.hbm %s467_s1, 256 }
  0x14   :  { %p321_p8 = scmp.ne.s32.totalorder %s467_s1, %s320_s25  ;;  %p324_p9 = scmp.lt.u32.totalorder %s320_s25, %s467_s1 }
  0x16   :  { %p326_p10 = pnand %p324_p9, %p321_p8 }
  0x18   :  { %329 = shalt.err (!%p326_p10)
}
  0x19   :  { %s330_s30 = scalar_lea.vmem %s398_s12, 256  ;;  %p335_p12 = scmp.lt.s32.totalorder %s398_s12, %s398_s12 }
  0x1a   :  { %p331_p11 = scmp.ne.s32.totalorder %s398_s12, %s330_s30  ;;  %p336_p13 = scmp.lt.s32.totalorder %s330_s30, %s330_s30 }
  0x1c   :  { %p337_p0 = por %p336_p13, %p335_p12 }
  0x1e   :  { %p338_p1 = pnand %p337_p0, %p331_p11 }
  0x20   :  { %341 = shalt.err (!%p338_p1)
}
  0x21   :  { %s372_s0 = smov 128   ;;  %s373_s3 = smov 8  }
  0x22   :  { %31 = dma.hbm_to_vmem [thread:$0]  %s467_s1, 256, %s398_s12, [#allocation6], %s372_s0, %s372_s0, %s373_s3  }
  0x23   :  { %364 = dma.done.wait [#allocation3], 64  }
  0x24   :  { %365 = vsyncadd [#allocation3], 4294967232 }
  0x25   :  { %366 = dma.done.wait [#allocation6], 256  }
  0x26   :  { %367 = vsyncadd [#allocation6], 4294967040  ;;  %v374_v0 = vmov 0.0   ;;  %vm375_vm0 = vmmov 0   ;;  %vm44_vm1 = vcmask 64512   ;;  %v42_v1 = vld [vmem:[#allocation5 + $0x8] sm:$0xff] }
  0x27   :  { %272 = vmatprep.subr.mxu0 %v374_v0  ;;  %274 = vmatprep.mubr.msk.f32.mxu0 %vm375_vm0, %v374_v0  ;;  %v43_v2 = vld [vmem:[#allocation2] sm:$0xf]  ;;  %v264_v3 = vld [vmem:[#allocation5 + $0x2] ss:$0 sm:$0xff]  ;;  %v265_v4 = vld [vmem:[#allocation5 + $0x3] ss:$0 sm:$0xff] }
  0x28   :  { %273 = vmatpush3.msra.mxu0 %v42_v1  ;;  %v376_v20 = vmov 2102212464   ;;  %v377_v22 = vmov 920167782   ;;  %v378_v26 = vmov 1326507024  }
  0x29   :  { %275 = vmatmul.mubr.msk.f32.vlgmr.msra.gmra.mrb[0].mxu0 %vm44_vm1, %v43_v2  ;;  %v379_v28 = vmov 683565275   ;;  %v380_v30 = vmov 2475754826   ;;  %v381_v33 = vmov 2131351028  }
  0x2a   :  { %s382_s1 = smov [#allocation7]  }
  0x2b   :  { %s251_s6 = sshll.u32 %s382_s1, 4  ;;  %s252_s6 = int_to_ptr.vmem [resolvable:$true] %s251_s6 }
  0x2c   :  { %s342_s7 = scalar_lea.vmem %s252_s6, 64  ;;  %p347_p3 = scmp.lt.s32.totalorder %s252_s6, %s252_s6 }
  0x2d   :  { %p343_p2 = scmp.ne.s32.totalorder %s252_s6, %s342_s7  ;;  %p348_p4 = scmp.lt.s32.totalorder %s342_s7, %s342_s7 }
  0x2f   :  { %p349_p5 = por %p348_p4, %p347_p3 }
  0x31   :  { %p350_p6 = pnand %p349_p5, %p343_p2 }
  0xfc   :  { %v429_v5 = vpop.f32.mrb[0].mxu0 }
  0xfd   :  { %v133_v6 = vmul.f32 %v264_v3, %v429_v5  ;;  %v276_v7 = vpop.f32.mrb[1].mxu0 }
  0xff   :  { %v432_v8 = vadd.f32 %v265_v4, %v133_v6 }
 0x101   :  { %v142_v9 = vand.u32 2139095040, %v432_v8  ;;  %v139_v10 = vand.u32 2147483647, %v432_v8  ;;  %vm141_vm9 = vcmp.lt.s32.totalorder %v432_v8, 0  ;;  %vm231_vm14 = vweird.f32 %v432_v8 }
 0x103   :  { %v143_v11 = vshrl.u32 %v142_v9, 23  ;;  %v146_v13 = vand.u32 8388607, %v139_v10  ;;  %vm140_vm10 = vcmp.le.f32.partialorder %v139_v10, 0.7853982 }
 0x105   :  { %v266_v12 = vadd.s32 4294967169, %v143_v11  ;;  %v147_v16 = vor.u32 8388608, %v146_v13 }
 0x107   :  { %v149_v14 = vadd.s32 1, %v266_v12  ;;  %v187_v24 = vshll.u32 %v147_v16, 8 }
 0x109   :  { %vm150_vm2 = vcmp.gt.s32.totalorder %v149_v14, 0 }
 0x10a   :  { %v151_v15 = vsel %vm150_vm2, %v149_v14, 0 }
 0x10b   :  { %v153_v17 = vand.u32 31, %v151_v15  ;;  %v152_v18 = vshrl.u32 %v151_v15, 5 }
 0x10d   :  { %v154_v19 = vsub.s32 32, %v153_v17  ;;  %v165_v21 = vshll.u32 %v376_v20, %v153_v17  ;;  %v168_v23 = vshll.u32 %v377_v22, %v153_v17  ;;  %v156_v29 = vshll.u32 %v379_v28, %v153_v17 }
 0x10e   :  { %v159_v32 = vshll.u32 %v380_v30, %v153_v17  ;;  %v162_v35 = vshll.u32 %v381_v33, %v153_v17  ;;  %vm174_vm3 = vcmp.lt.s32.totalorder %v152_v18, 4  ;;  %vm171_vm4 = vcmp.lt.s32.totalorder %v152_v18, 1 }
 0x10f   :  { %v166_v25 = vshrl.u32 %v377_v22, %v154_v19  ;;  %v169_v27 = vshrl.u32 %v378_v26, %v154_v19  ;;  %v157_v31 = vshrl.u32 %v380_v30, %v154_v19  ;;  %v160_v34 = vshrl.u32 %v381_v33, %v154_v19 }
 0x110   :  { %v163_v36 = vshrl.u32 %v376_v20, %v154_v19  ;;  %v155_v40 = vshrl.u32 %v379_v28, %v154_v19  ;;  %vm172_vm5 = vcmp.lt.s32.totalorder %v152_v18, 2  ;;  %vm173_vm6 = vcmp.lt.s32.totalorder %v152_v18, 3 }
 0x111   :  { %v167_v37 = vor.u32 %v166_v25, %v165_v21  ;;  %v170_v38 = vor.u32 %v169_v27, %v168_v23  ;;  %v158_v39 = vor.u32 %v157_v31, %v156_v29  ;;  %v161_v41 = vor.u32 %v160_v34, %v159_v32  ;;  %v262_v29 = vld [vmem:[#allocation5] ss:$0 sm:$0xff]  ;;  %v263_v32 = vld [vmem:[#allocation5 + $0x1] ss:$0 sm:$0xff] }
 0x112   :  { %v164_v42 = vor.u32 %v163_v36, %v162_v35  ;;  %v122_v31 = vmul.f32 %v262_v29, %v429_v5 }
 0x113   :  { %v180_v43 = vsel %vm174_vm3, %v167_v37, 920167782  ;;  %v184_v44 = vsel %vm174_vm3, %v170_v38, 1326507024  ;;  %v179_v46 = vsel %vm171_vm4, %v158_v39, %v161_v41  ;;  %v175_v49 = vsel %vm171_vm4, %v155_v40, %v158_v39 }
 0x114   :  { %v176_v45 = vsel %vm174_vm3, %v164_v42, 2102212464  ;;  %v181_v47 = vsel %vm173_vm6, %v164_v42, %v180_v43  ;;  %v183_v48 = vsel %vm171_vm4, %v161_v41, %v164_v42  ;;  %v185_v52 = vsel %vm173_vm6, %v167_v37, %v184_v44 }
 0x115   :  { %v177_v50 = vsel %vm173_vm6, %v161_v41, %v176_v45  ;;  %v182_v51 = vsel %vm172_vm5, %v179_v46, %v181_v47  ;;  %v186_v53 = vsel %vm172_vm5, %v183_v48, %v185_v52  ;;  %v127_v36 = vadd.f32 %v263_v32, %v122_v31 }
 0x116   :  { %v438_v54 = vmul.u32.u64.low %v187_v24, %v182_v51  ;;  %v439_v55 = vmul.u32.u64.high %v187_v24, %v182_v51, %v438_v54  ;;  %v441_v56 = vmul.u32.u64.low %v187_v24, %v186_v53  ;;  %v442_v57 = vmul.u32.u64.high %v187_v24, %v186_v53, %v441_v56 }
 0x117   :  { %v178_v58 = vsel %vm172_vm5, %v175_v49, %v177_v50  ;;  %v128_v40 = vmax.f32 %v127_v36, 0.0 }
 0x118   :  { %v197_v59 = vadd.s32 1, %v439_v55  ;;  %v194_v60 = vmul.u32 %v187_v24, %v178_v58  ;;  %vm196_vm7 = vc.u32 %v442_v57, %v438_v54  ;;  %v195_v11 = vadd.s32 %v438_v54, %v442_v57 }
 0x11a   :  { %v198_v61 = vsel %vm196_vm7, %v197_v59, %v439_v55 }
 0x11b   :  { %v199_v62 = vadd.s32 %v198_v61, %v194_v60 }
 0x11d   :  { %v200_v63 = vadd.s32 536870912, %v199_v62 }
 0x11f   :  { %v201_v0 = vshrl.u32 %v200_v63, 30 }
 0x121   :  { %v202_v1 = vshll.u32 %v201_v0, 30  ;;  %v225_v23 = vsub.s32 4, %v201_v0 }
 0x123   :  { %v203_v2 = vsub.s32 %v199_v62, %v202_v1  ;;  %v226_v26 = vsel %vm141_vm9, %v225_v23, %v201_v0 }
 0x124   :  { %v228_v28 = vsel %vm140_vm10, 0, %v226_v26 }
 0x125   :  { %v205_v3 = vsub.s32 0, %v203_v2  ;;  %v232_v30 = vadd.s32 3, %v228_v28 }
 0x127   :  { %v267_v4 = vmin.u32 %v205_v3, %v203_v2  ;;  %v233_v33 = vand.u32 3, %v232_v30 }
 0x129   :  { %v207_v6 = vclz %v267_v4  ;;  %vm238_vm11 = vcmp.eq.s32.totalorder %v233_v33, 2  ;;  %vm235_vm12 = vcmp.eq.s32.totalorder %v233_v33, 0  ;;  %vm234_vm13 = vcmp.lt.s32.totalorder %v233_v33, 2 }
 0x12b   :  { %v268_v7 = vadd.s32 4294967294, %v207_v6 }
 0x12d   :  { %vm269_vm8 = vcmp.lt.s32.totalorder %v268_v7, 0 }
 0x12e   :  { %v210_v9 = vsel %vm269_vm8, 0, %v268_v7 }
 0x12f   :  { %v211_v12 = vsub.s32 32, %v210_v9  ;;  %v215_v13 = vsub.s32 4294967266, %v210_v9  ;;  %v212_v14 = vshll.u32 %v203_v2, %v210_v9 }
 0x131   :  { %v213_v15 = vshrl.u32 %v195_v11, %v211_v12  ;;  %v216_v16 = vadd.s32 127, %v215_v13 }
 0x133   :  { %v214_v17 = vor.u32 %v213_v15, %v212_v14  ;;  %v217_v18 = vshll.u32 %v216_v16, 23 }
 0x135   :  { %v218_v19 = vor.u32 4788187, %v217_v18  ;;  %v221_v21 = vcvt.s32.f32 %v214_v17 }
 0x137   :  { %v219_v20 = vand.u32 2147483647, %v218_v19 }
 0x139   :  { %v222_v22 = vmul.f32 %v221_v21, %v219_v20 }
 0x13b   :  { %v223_v24 = vxor.u32 2147483648, %v222_v22 }
 0x13d   :  { %v224_v25 = vsel %vm141_vm9, %v223_v24, %v222_v22 }
 0x13e   :  { %v227_v27 = vsel %vm140_vm10, %v432_v8, %v224_v25 }
 0x13f   :  { %294 = vcosq.f32 %v227_v27 }
 0x140   :  { %296 = vsinq.f32 %v227_v27 }
 0x149   :  { %v295_v34 = vpop.eup %294 }
 0x14a   :  { %v297_v35 = vpop.eup %296  ;;  %v239_v37 = vxor.u32 2147483648, %v295_v34 }
 0x14b   :  { %v236_v38 = vxor.u32 2147483648, %v297_v35 }
 0x14c   :  { %v240_v10 = vsel %vm238_vm11, %v239_v37, %v297_v35 }
 0x14d   :  { %v237_v39 = vsel %vm235_vm12, %v295_v34, %v236_v38 }
 0x14e   :  { %v241_v41 = vsel %vm234_vm13, %v237_v39, %v240_v10 }
 0x14f   :  { %v242_v42 = vsel %vm231_vm14, nan, %v241_v41 }
 0x150   :  { %v243_v5 = vadd.f32 %v242_v42, %v128_v40 }
 0x152   :  { %244 = vst [vmem:[#allocation7] sm:$0xf] %v243_v5 }
 0x153   :  { %353 = shalt.err (!%p350_p6)
}
 0x154   :  { %s354_s10 = scalar_lea.hbm %s468_s2, 64 }
 0x155   :  { %p355_p7 = scmp.ne.s32.totalorder %s468_s2, %s354_s10  ;;  %p358_p8 = scmp.lt.u32.totalorder %s354_s10, %s468_s2 }
 0x157   :  { %p360_p9 = pnand %p358_p8, %p355_p7 }
 0x159   :  { %363 = shalt.err (!%p360_p9)
}
 0x15a   :  { %254 = dma.vmem_to_hbm [thread:$0]  %s252_s6, 64, %s468_s2, [#allocation4]  }
 0x15b   :  { %368 = dma.done.wait [#allocation4], 64  }
 0x15c   :  { %369 = vsyncadd [#allocation4], 4294967232 }
 0x15d   :  { %258 = vsyncpa [#allocation3], 1 }
 0x15e   :  { %259 = vsyncpa [#allocation6], 1 }
 0x15f   :  { %260 = vsyncpa [#allocation4], 1 }

</bundles_post_ra>
